<compile_context>
chip_gen: v7x
topology: tpu7x:2x2x1
jax: 0.10.0
libtpu: 0.0.40
codegen_flags: <defaults>
</compile_context>

<pallas_src>
import functools

import jax
import jax.numpy as jnp
from jax import lax
from jax.experimental import pallas as pl
from jax.experimental.pallas import tpu as pltpu

LANE = 128                 # vreg lane width
SUBLANE = 8                # vreg sublane count
MAX_TILE_ROWS = 4096       # 4096*128*4B = 2 MiB per f32 input tile
NUM_PARALLEL_CHUNKS = 2    # split the reduction across TensorCores (v7x); free on 1-TC chips


def _ssd_kernel(orig_ref, recon_ref, out_ref, *,
                rows_total, tile_rows, steps_per_chunk):
    """Accumulate per-(sublane, lane) partial sums of squared differences.

    out_ref is a (1, 8, 128) f32 block that stays resident across the reduction
    ('arbitrary') grid axis and acts as the accumulator.
    """
    p = pl.program_id(0)   # parallel chunk (TensorCore split)
    s = pl.program_id(1)   # reduction step inside the chunk

    @pl.when(s == 0)
    def _():
        out_ref[...] = jnp.zeros_like(out_ref)

    # Mask rows beyond the logical end of the (rows_total, LANE) slab: edge blocks
    # (and fully out-of-range padding steps of the last chunk) read unspecified data.
    base_row = (p * steps_per_chunk + s) * tile_rows
    row_ids = base_row + lax.broadcasted_iota(jnp.int32, (tile_rows, LANE), 0)
    valid = row_ids < rows_total

    o = orig_ref[...].astype(jnp.float32)
    r = recon_ref[...].astype(jnp.float32)
    d = jnp.where(valid, o - r, 0.0)
    dsq = d * d

    # VPU-only fold of the tile down to one (8, 128) vreg of per-lane partial sums.
    partial = dsq.reshape(tile_rows // SUBLANE, SUBLANE, LANE).sum(axis=0)
    out_ref[...] += partial[jnp.newaxis]


def rate_distortion_loss(original, reconstructed, bits, lambda_rd=0.001):
    """JAX/Pallas equivalent of RateDistortionLoss.forward.

    original, reconstructed: (N, C, H, W) arrays (f32 or bf16)
    bits: scalar (0-d) float
    Returns dict with scalar 'loss', 'distortion', 'rate'.
    """
    N, C, H, W = original.shape
    numel = N * C * H * W
    num_pixels = N * H * W

    flat_o = original.reshape(-1)          # keep native dtype (bf16 stays bf16)
    flat_r = reconstructed.reshape(-1)

    # Lane-dense (rows, 128) slab. Only align to the (8, 128) vreg boundary;
    # tile-boundary overrun is handled by in-kernel masking (no tile-sized pad).
    rows = pl.cdiv(numel, LANE)
    rows = pl.cdiv(rows, SUBLANE) * SUBLANE
    padded = rows * LANE
    if padded != numel:
        # TODO(synk): a fully pad-free path for non-1024-multiple sizes would run the
        # <1024-element remainder through a tiny separate pass instead of this copy.
        flat_o = jnp.pad(flat_o, (0, padded - numel))
        flat_r = jnp.pad(flat_r, (0, padded - numel))
    o2 = flat_o.reshape(rows, LANE)
    r2 = flat_r.reshape(rows, LANE)

    # Tile selection: biggest tile that fits comfortably in VMEM on all generations
    # (2 inputs x 2 buffers x 2 MiB = 8 MiB << 32 MiB scoped default, << v7x 64 MiB).
    tile_rows = min(MAX_TILE_ROWS, rows)           # both are multiples of 8
    total_steps = pl.cdiv(rows, tile_rows)
    n_par = min(NUM_PARALLEL_CHUNKS, total_steps)  # only split if there is enough work
    steps_per_chunk = pl.cdiv(total_steps, n_par)

    # Clamp the block index so padding steps of the last chunk never map a fully
    # out-of-bounds block (their contribution is masked to zero in the kernel anyway).
    def row_block_index(p, s):
        step = jnp.minimum(p * steps_per_chunk + s, total_steps - 1)
        return (step, 0)

    kernel = functools.partial(
        _ssd_kernel,
        rows_total=rows,
        tile_rows=tile_rows,
        steps_per_chunk=steps_per_chunk,
    )

    in_bytes = numel * (original.dtype.itemsize + reconstructed.dtype.itemsize)
    cost = pl.CostEstimate(
        flops=3 * numel,                                   # sub, mul, add per element
        transcendentals=0,
        bytes_accessed=in_bytes + n_par * SUBLANE * LANE * 4,
    )

    partials = pl.pallas_call(
        kernel,
        out_shape=jax.ShapeDtypeStruct((n_par, SUBLANE, LANE), jnp.float32),
        grid_spec=pltpu.PrefetchScalarGridSpec(
            num_scalar_prefetch=0,
            grid=(n_par, steps_per_chunk),
            in_specs=[
                # NOTE: if a trace ever shows exposed input DMA, add
                # pipeline_mode=pl.Buffered(3) here (re-check VMEM on v7x).
                pl.BlockSpec((tile_rows, LANE), row_block_index),
                pl.BlockSpec((tile_rows, LANE), row_block_index),
            ],
            out_specs=pl.BlockSpec((1, SUBLANE, LANE), lambda p, s: (p, 0, 0)),
        ),
        compiler_params=pltpu.CompilerParams(
            dimension_semantics=("parallel", "arbitrary"),
        ),
        cost_estimate=cost,
    )(o2, r2)

    # Trivial scalar epilogue (a handful of flops) in plain JAX.
    ssd = jnp.sum(partials)
    distortion = (ssd / numel).astype(jnp.float32)
    rate = (jnp.asarray(bits, jnp.float32) / num_pixels).astype(jnp.float32)
    loss = distortion + lambda_rd * rate
    return {"loss": loss, "distortion": distortion, "rate": rate}


if __name__ == "__main__":
    key = jax.random.PRNGKey(0)
    k1, k2, k3 = jax.random.split(key, 3)

    # NCHW inputs, consistent with the PyTorch module
    N, C, H, W = 2, 4, 16, 16
    original = jax.random.normal(k1, (N, C, H, W), dtype=jnp.float32)
    reconstructed = original + 0.1 * jax.random.normal(k2, (N, C, H, W), dtype=jnp.float32)
    bits = jnp.abs(jax.random.normal(k3, (), dtype=jnp.float32)) * 1000.0

    lambda_rd = 0.001
    out = rate_distortion_loss(original, reconstructed, bits, lambda_rd=lambda_rd)
    out = jax.block_until_ready(out)

    # pure-JAX reference check
    ref_dist = jnp.mean((original - reconstructed) ** 2)
    ref_rate = bits / (N * H * W)
    ref_loss = ref_dist + lambda_rd * ref_rate
    assert jnp.allclose(out["distortion"], ref_dist, rtol=1e-5, atol=1e-6)
    assert jnp.allclose(out["rate"], ref_rate, rtol=1e-5, atol=1e-6)
    assert jnp.allclose(out["loss"], ref_loss, rtol=1e-5, atol=1e-6)

    print("KERNEL_OK")
</pallas_src>

<mosaic_0001>
module attributes {stable_mosaic.version = 11 : i64} {
  func.func @_ssd_kernel(%arg0: i32, %arg1: i32, %arg2: memref<16x128xf32, #tpu.memory_space<vmem>>, %arg3: memref<16x128xf32, #tpu.memory_space<vmem>>, %arg4: memref<1x8x128xf32, #tpu.memory_space<vmem>>) attributes {dimension_semantics = [#tpu.dimension_semantics<parallel>, #tpu.dimension_semantics<arbitrary>], iteration_bounds = array<i64: 1, 1>, scalar_prefetch = 0 : i64, scratch_operands = 0 : i64, tpu.core_type = #tpu.core_type<tc>, window_params = [{transform_indices = @transform_0, window_bounds = array<i64: 16, 128>}, {transform_indices = @transform_1, window_bounds = array<i64: 16, 128>}, {transform_indices = @transform_2, window_bounds = array<i64: 1, 8, 128>}]} {
    %c0_i32 = arith.constant 0 : i32
    %0 = arith.cmpi eq, %arg1, %c0_i32 : i32
    %1 = arith.extui %0 : i1 to i32
    %c0_i32_0 = arith.constant 0 : i32
    %2 = arith.cmpi ne, %1, %c0_i32_0 : i32
    scf.if %2 {
      %cst_12 = arith.constant 0.000000e+00 : f32
      %23 = vector.broadcast %cst_12 : f32 to vector<1x8x128xf32>
      %c0_13 = arith.constant 0 : index
      %c0_14 = arith.constant 0 : index
      %c0_15 = arith.constant 0 : index
      %24 = vector.load %arg4[%c0_13, %c0_14, %c0_15] : memref<1x8x128xf32, #tpu.memory_space<vmem>>, vector<1x8x128xf32>
      tpu.vector_store %arg4[%c0_13, %c0_14, %c0_15], %23 {strides = array<i32>} : memref<1x8x128xf32, #tpu.memory_space<vmem>>, vector<1x8x128xf32>,
    } else {
    }
    %c1_i32 = arith.constant 1 : i32
    %3 = arith.muli %arg0, %c1_i32 : i32
    %4 = arith.addi %3, %arg1 : i32
    %c16_i32 = arith.constant 16 : i32
    %5 = arith.muli %4, %c16_i32 : i32
    %6 = tpu.iota {dimensions = array<i32: 0>} : vector<16x128xi32>
    %7 = vector.broadcast %5 : i32 to vector<16x128xi32>
    %8 = arith.addi %7, %6 : vector<16x128xi32>
    %c16_i32_1 = arith.constant 16 : i32
    %9 = vector.broadcast %c16_i32_1 : i32 to vector<16x128xi32>
    %10 = arith.cmpi slt, %8, %9 : vector<16x128xi32>
    %c0 = arith.constant 0 : index
    %c0_2 = arith.constant 0 : index
    %11 = vector.load %arg2[%c0, %c0_2] : memref<16x128xf32, #tpu.memory_space<vmem>>, vector<16x128xf32>
    %c0_3 = arith.constant 0 : index
    %c0_4 = arith.constant 0 : index
    %12 = vector.load %arg3[%c0_3, %c0_4] : memref<16x128xf32, #tpu.memory_space<vmem>>, vector<16x128xf32>
    %13 = arith.subf %11, %12 : vector<16x128xf32>
    %cst = arith.constant 0.000000e+00 : f32
    %14 = vector.broadcast %cst : f32 to vector<16x128xf32>
    %15 = arith.select %10, %13, %14 : vector<16x128xi1>, vector<16x128xf32>
    %16 = arith.mulf %15, %15 : vector<16x128xf32>
    %17 = vector.shape_cast %16 : vector<16x128xf32> to vector<2x8x128xf32>
    %cst_5 = arith.constant dense<0.000000e+00> : vector<8x128xf32>
    %18 = vector.multi_reduction <add>, %17, %cst_5 [0] : vector<2x8x128xf32> to vector<8x128xf32>
    %c0_6 = arith.constant 0 : index
    %c0_7 = arith.constant 0 : index
    %c0_8 = arith.constant 0 : index
    %19 = vector.load %arg4[%c0_6, %c0_7, %c0_8] : memref<1x8x128xf32, #tpu.memory_space<vmem>>, vector<1x8x128xf32>
    %20 = vector.shape_cast %18 : vector<8x128xf32> to vector<1x8x128xf32>
    %21 = arith.addf %19, %20 : vector<1x8x128xf32>
    %c0_9 = arith.constant 0 : index
    %c0_10 = arith.constant 0 : index
    %c0_11 = arith.constant 0 : index
    %22 = vector.load %arg4[%c0_9, %c0_10, %c0_11] : memref<1x8x128xf32, #tpu.memory_space<vmem>>, vector<1x8x128xf32>
    tpu.vector_store %arg4[%c0_9, %c0_10, %c0_11], %21 {strides = array<i32>} : memref<1x8x128xf32, #tpu.memory_space<vmem>>, vector<1x8x128xf32>,
    return
  }
  func.func @transform_0(%arg0: i32, %arg1: i32) -> (i32, i32) {
    %c1_i32 = arith.constant 1 : i32
    %0 = arith.muli %arg0, %c1_i32 : i32
    %1 = arith.addi %0, %arg1 : i32
    %c0_i32 = arith.constant 0 : i32
    %2 = arith.minsi %1, %c0_i32 : i32
    %c0_i32_0 = arith.constant 0 : i32
    %c0_i32_1 = arith.constant 0 : i32
    return %2, %c0_i32_0 : i32, i32
  }
  func.func @transform_1(%arg0: i32, %arg1: i32) -> (i32, i32) {
    %c1_i32 = arith.constant 1 : i32
    %0 = arith.muli %arg0, %c1_i32 : i32
    %1 = arith.addi %0, %arg1 : i32
    %c0_i32 = arith.constant 0 : i32
    %2 = arith.minsi %1, %c0_i32 : i32
    %c0_i32_0 = arith.constant 0 : i32
    %c0_i32_1 = arith.constant 0 : i32
    return %2, %c0_i32_0 : i32, i32
  }
  func.func @transform_2(%arg0: i32, %arg1: i32) -> (i32, i32, i32) {
    %c0_i32 = arith.constant 0 : i32
    %c0_i32_0 = arith.constant 0 : i32
    %c0_i32_1 = arith.constant 0 : i32
    return %arg0, %c0_i32, %c0_i32_0 : i32, i32, i32
  }
}

</mosaic_0001>

<bundles_post_ra>
// kernel: tpu_custom_call.1
= control target key start
LH: loop header
LB: loop body
LE: loop exit
PB: predicated region body
PF: predicated region fallthrough
CT: control target
= control target key end

     0   :  { %7 = vsyncpa [#allocation3], 0  ;;  %s243_s0 = inlined_call_operand.hbm [shape: f32[16,128], index: 0, kind: input, shape index: {}]   ;;  %s244_s1 = inlined_call_operand.hbm [shape: f32[16,128], index: 1, kind: input, shape index: {}]   ;;  %s245_s2 = inlined_call_operand.hbm [shape: f32[1,8,128], index: 2, kind: output, shape index: {}]  }
   0x1   :  { %8 = vsyncpa [#allocation6], 0 }
   0x2   :  { %9 = vsyncpa [#allocation4], 0  ;;  %s187_s9 = smov [#allocation2]   ;;  %s115_s13 = scalar_lea.hbm %s243_s0, 256 }
   0x3   :  { %s21_s10 = sshll.u32 %s187_s9, 4  ;;  %p116_p0 = scmp.ne.s32.totalorder %s243_s0, %s115_s13  ;;  %s22_s10 = int_to_ptr.vmem [resolvable:$true] %s21_s10 }
   0x4   :  { %p119_p1 = scmp.lt.u32.totalorder %s115_s13, %s243_s0 }
   0x6   :  { %p121_p2 = pnand %p119_p1, %p116_p0 }
   0x8   :  { %124 = shalt.err (!%p121_p2)
}
   0x9   :  { %s125_s18 = scalar_lea.vmem %s22_s10, 256  ;;  %p130_p4 = scmp.lt.s32.totalorder %s22_s10, %s22_s10 }
   0xa   :  { %p126_p3 = scmp.ne.s32.totalorder %s22_s10, %s125_s18  ;;  %p131_p5 = scmp.lt.s32.totalorder %s125_s18, %s125_s18 }
   0xc   :  { %p132_p6 = por %p131_p5, %p130_p4 }
   0xe   :  { %p133_p7 = pnand %p132_p6, %p126_p3 }
  0x10   :  { %136 = shalt.err (!%p133_p7)
}
  0x11   :  { %s188_s19 = smov 128   ;;  %s189_s20 = smov 8  }
  0x12   :  { %27 = dma.hbm_to_vmem [thread:$0]  %s243_s0, 256, %s22_s10, [#allocation3], %s188_s19, %s188_s19, %s189_s20  }
  0x13   :  { %s190_s23 = smov [#allocation5]   ;;  %s137_s27 = scalar_lea.hbm %s244_s1, 256 }
  0x14   :  { %s39_s24 = sshll.u32 %s190_s23, 4  ;;  %p138_p8 = scmp.ne.s32.totalorder %s244_s1, %s137_s27  ;;  %s40_s24 = int_to_ptr.vmem [resolvable:$true] %s39_s24 }
  0x15   :  { %p141_p9 = scmp.lt.u32.totalorder %s137_s27, %s244_s1 }
  0x17   :  { %p143_p10 = pnand %p141_p9, %p138_p8 }
  0x19   :  { %146 = shalt.err (!%p143_p10)
}
  0x1a   :  { %s147_s4 = scalar_lea.vmem %s40_s24, 256  ;;  %p152_p12 = scmp.lt.s32.totalorder %s40_s24, %s40_s24 }
  0x1b   :  { %p148_p11 = scmp.ne.s32.totalorder %s40_s24, %s147_s4  ;;  %p153_p13 = scmp.lt.s32.totalorder %s147_s4, %s147_s4 }
  0x1d   :  { %p154_p0 = por %p153_p13, %p152_p12 }
  0x1f   :  { %p155_p1 = pnand %p154_p0, %p148_p11 }
  0x21   :  { %158 = shalt.err (!%p155_p1)
}
  0x22   :  { %45 = dma.hbm_to_vmem [thread:$0]  %s244_s1, 256, %s40_s24, [#allocation6], %s188_s19, %s188_s19, %s189_s20  }
  0x23   :  { %181 = dma.done.wait [#allocation3], 256  }
  0x24   :  { %182 = vsyncadd [#allocation3], 4294967040 }
  0x25   :  { %183 = dma.done.wait [#allocation6], 256  }
  0x26   :  { %184 = vsyncadd [#allocation6], 4294967040  ;;  %v75_v0 = vld [vmem:[#allocation2] sm:$0xff]  ;;  %v76_v1 = vld [vmem:[#allocation2 + $0x8] sm:$0xff]  ;;  %s191_s6 = smov [#allocation7]  }
  0x27   :  { %v77_v2 = vld [vmem:[#allocation5] sm:$0xff]  ;;  %v78_v3 = vld [vmem:[#allocation5 + $0x8] sm:$0xff]  ;;  %s95_s7 = sshll.u32 %s191_s6, 4  ;;  %s96_s7 = int_to_ptr.vmem [resolvable:$true] %s95_s7 }
  0x28   :  { %v79_v4 = vsub.f32 %v75_v0, %v77_v2  ;;  %v80_v5 = vsub.f32 %v76_v1, %v78_v3  ;;  %s159_s8 = scalar_lea.vmem %s96_s7, 128  ;;  %p164_p3 = scmp.lt.s32.totalorder %s96_s7, %s96_s7 }
  0x29   :  { %p160_p2 = scmp.ne.s32.totalorder %s96_s7, %s159_s8  ;;  %p165_p4 = scmp.lt.s32.totalorder %s159_s8, %s159_s8 }
  0x2a   :  { %v83_v6 = vmul.f32 %v79_v4, %v79_v4  ;;  %v84_v7 = vmul.f32 %v80_v5, %v80_v5 }
  0x2b   :  { %p166_p5 = por %p165_p4, %p164_p3 }
  0x2c   :  { %v85_v8 = vadd.f32 %v84_v7, %v83_v6 }
  0x2d   :  { %p167_p6 = pnand %p166_p5, %p160_p2 }
  0x2e   :  { %88 = vst [vmem:[#allocation7] sm:$0xff] %v85_v8 }
  0x2f   :  { %170 = shalt.err (!%p167_p6)
}
  0x30   :  { %s171_s10 = scalar_lea.hbm %s245_s2, 128 }
  0x31   :  { %p172_p7 = scmp.ne.s32.totalorder %s245_s2, %s171_s10  ;;  %p175_p8 = scmp.lt.u32.totalorder %s171_s10, %s245_s2 }
  0x33   :  { %p177_p9 = pnand %p175_p8, %p172_p7 }
  0x35   :  { %180 = shalt.err (!%p177_p9)
}
  0x36   :  { %98 = dma.vmem_to_hbm [thread:$0]  %s96_s7, 128, %s245_s2, [#allocation4]  }
  0x37   :  { %185 = dma.done.wait [#allocation4], 128  }
  0x38   :  { %186 = vsyncadd [#allocation4], 4294967168 }
  0x39   :  { %102 = vsyncpa [#allocation3], 1 }
  0x3a   :  { %103 = vsyncpa [#allocation6], 1 }
  0x3b   :  { %104 = vsyncpa [#allocation4], 1 }

</bundles_post_ra>
